<compile_context>
chip_gen: v5e
topology: v5e:2x2
jax: 0.10.0
libtpu: 0.0.40
codegen_flags: <defaults>
</compile_context>

<pallas_src>
import jax
import jax.numpy as jnp
from jax.experimental import pallas as pl
from jax.experimental.pallas import tpu as pltpu


def _round_up(x, m):
    return ((x + m - 1) // m) * m


def _sse_kernel(w_ref, x_ref, o_ref):
    # w_ref: (1, C)           conv weight (out_channels=1, in_channels=C)
    # x_ref: (1, C, TILE_HW)  one spatial tile of one batch element
    # o_ref: (1, C, TILE_HW)
    # 1x1 conv == channel contraction on the MXU, f32 accumulate.
    q = jnp.dot(w_ref[...], x_ref[0], preferred_element_type=jnp.float32)  # (1, TILE)
    q = jax.nn.sigmoid(q).astype(x_ref.dtype)                              # attention map
    # Re-read x_ref here (don't keep a (C, TILE) value live across the dot):
    # lets Mosaic stream vld -> VPU -> vst without spilling the tile to VMEM.
    o_ref[0] = (x_ref[0] * q).astype(o_ref.dtype)


def sse_forward(U, conv_weight, *, tile_hw_cap=8192, vmem_budget_bytes=12 << 20):
    """U: (N, C, H, W); conv_weight: (1, C, 1, 1) (no bias)."""
    N, C, H, W = U.shape
    HW = H * W
    itemsize = jnp.dtype(U.dtype).itemsize

    # ---- Tile selection -----------------------------------------------------
    # Target ~2 MiB per input-block DMA (mem-bound kernel; big DMAs amortize the
    # ~0.35 us per-grid-step overhead).
    target_bytes = 2 << 20
    tile = _round_up(max(target_bytes // (C * itemsize), 128), 128)
    tile = min(tile, tile_hw_cap)
    # Keep the pipeline working set (in+out, double-buffered) within budget.
    max_tile_vmem = max((vmem_budget_bytes // (4 * C * itemsize)) // 128 * 128, 128)
    tile = min(tile, max_tile_vmem)
    # Never larger than the (128-rounded) spatial extent.
    tile = min(tile, _round_up(HW, 128))
    # v7x has 2 TensorCores: a single-image call should still produce >=2 blocks.
    if N == 1 and HW > 128:
        tile = min(tile, _round_up(pl.cdiv(HW, 2), 128))

    grid = (N, pl.cdiv(HW, tile))

    x = U.reshape(N, C, HW)          # layout only — no pad, no extra HBM traffic
    w = conv_weight.reshape(1, C)    # hoisted once; resident in VMEM across grid

    cost = pl.CostEstimate(
        flops=(2 * C + 2) * N * HW,
        transcendentals=N * HW,
        bytes_accessed=2 * N * C * HW * itemsize + C * itemsize,
    )

    out = pl.pallas_call(
        _sse_kernel,
        out_shape=jax.ShapeDtypeStruct((N, C, HW), U.dtype),
        grid_spec=pltpu.PrefetchScalarGridSpec(
            num_scalar_prefetch=0,
            grid=grid,
            in_specs=[
                pl.BlockSpec((1, C), lambda n, t: (0, 0)),            # weight (resident)
                pl.BlockSpec((1, C, tile), lambda n, t: (n, 0, t)),   # spatial tile
            ],
            out_specs=pl.BlockSpec((1, C, tile), lambda n, t: (n, 0, t)),
        ),
        compiler_params=pltpu.CompilerParams(
            dimension_semantics=("parallel", "parallel"),
            vmem_limit_bytes=32 << 20,
        ),
        cost_estimate=cost,
    )(w, x)

    return out.reshape(N, C, H, W)


if __name__ == "__main__":
    key = jax.random.PRNGKey(0)
    k_u, k_w = jax.random.split(key)

    N, C, H, W = 2, 4, 16, 16
    U = jax.random.normal(k_u, (N, C, H, W), dtype=jnp.float32)
    # Conv2d(C, 1, kernel_size=1, bias=False) weight: (1, C, 1, 1)
    conv_weight = jax.random.normal(k_w, (1, C, 1, 1), dtype=jnp.float32) * 0.1

    out = sse_forward(U, conv_weight)
    out = jax.block_until_ready(out)

    # Pure-JAX reference check (same math as the PyTorch module).
    q_ref = jnp.einsum("nchw,c->nhw", U, conv_weight.reshape(-1))[:, None]
    ref = U * jax.nn.sigmoid(q_ref)
    assert out.shape == (N, C, H, W)
    assert jnp.allclose(out, ref, atol=1e-5, rtol=1e-5)

    print("KERNEL_OK")
</pallas_src>

<mosaic_0001>
module attributes {stable_mosaic.version = 11 : i64} {
  func.func @_sse_kernel(%arg0: i32, %arg1: i32, %arg2: memref<1x4xf32, #tpu.memory_space<vmem>>, %arg3: memref<1x4x256xf32, #tpu.memory_space<vmem>>, %arg4: memref<1x4x256xf32, #tpu.memory_space<vmem>>) attributes {dimension_semantics = [#tpu.dimension_semantics<parallel>, #tpu.dimension_semantics<parallel>], iteration_bounds = array<i64: 2, 1>, scalar_prefetch = 0 : i64, scratch_operands = 0 : i64, tpu.core_type = #tpu.core_type<tc>, window_params = [{pipeline_mode = #tpu.pipeline_mode<synchronous>, transform_indices = @transform_0, window_bounds = array<i64: 1, 4>}, {transform_indices = @transform_1, window_bounds = array<i64: 1, 4, 256>}, {transform_indices = @transform_2, window_bounds = array<i64: 1, 4, 256>}]} {
    %c0 = arith.constant 0 : index
    %c0_0 = arith.constant 0 : index
    %0 = vector.load %arg2[%c0, %c0_0] : memref<1x4xf32, #tpu.memory_space<vmem>>, vector<1x4xf32>
    %c0_1 = arith.constant 0 : index
    %c0_2 = arith.constant 0 : index
    %c0_3 = arith.constant 0 : index
    %1 = vector.load %arg3[%c0_1, %c0_2, %c0_3] : memref<1x4x256xf32, #tpu.memory_space<vmem>>, vector<1x4x256xf32>
    %2 = vector.shape_cast %1 : vector<1x4x256xf32> to vector<4x256xf32>
    %cst = arith.constant dense<0.000000e+00> : vector<1x256xf32>
    %3 = tpu.matmul %0, %2, %cst {dimension_numbers = #tpu.dot_dimension_numbers<[1], [0], [0], [1], [0, 0, 1, 1], [], []>} : vector<1x4xf32>, vector<4x256xf32>, vector<1x256xf32> -> vector<1x256xf32>
    %4 = arith.negf %3 : vector<1x256xf32>
    %5 = math.exp %4 : vector<1x256xf32>
    %cst_4 = arith.constant 1.000000e+00 : f32
    %6 = vector.broadcast %cst_4 : f32 to vector<1x256xf32>
    %7 = arith.addf %6, %5 : vector<1x256xf32>
    %8 = arith.divf %6, %7 : vector<1x256xf32>
    %c0_5 = arith.constant 0 : index
    %c0_6 = arith.constant 0 : index
    %c0_7 = arith.constant 0 : index
    %9 = vector.load %arg3[%c0_5, %c0_6, %c0_7] : memref<1x4x256xf32, #tpu.memory_space<vmem>>, vector<1x4x256xf32>
    %10 = vector.shape_cast %9 : vector<1x4x256xf32> to vector<4x256xf32>
    %11 = vector.broadcast %8 : vector<1x256xf32> to vector<4x256xf32>
    %12 = arith.mulf %10, %11 : vector<4x256xf32>
    %c0_8 = arith.constant 0 : index
    %c0_9 = arith.constant 0 : index
    %c0_10 = arith.constant 0 : index
    %13 = vector.load %arg4[%c0_8, %c0_9, %c0_10] : memref<1x4x256xf32, #tpu.memory_space<vmem>>, vector<1x4x256xf32>
    %14 = vector.shape_cast %13 : vector<1x4x256xf32> to vector<4x256xf32>
    %15 = vector.shape_cast %12 : vector<4x256xf32> to vector<1x4x256xf32>
    tpu.vector_store %arg4[%c0_8, %c0_9, %c0_10], %15 {strides = array<i32>} : memref<1x4x256xf32, #tpu.memory_space<vmem>>, vector<1x4x256xf32>,
    return
  }
  func.func @transform_0(%arg0: i32, %arg1: i32) -> (i32, i32) {
    %c0_i32 = arith.constant 0 : i32
    %c0_i32_0 = arith.constant 0 : i32
    %c0_i32_1 = arith.constant 0 : i32
    return %c0_i32, %c0_i32_0 : i32, i32
  }
  func.func @transform_1(%arg0: i32, %arg1: i32) -> (i32, i32, i32) {
    %c0_i32 = arith.constant 0 : i32
    %c0_i32_0 = arith.constant 0 : i32
    return %arg0, %c0_i32, %arg1 : i32, i32, i32
  }
  func.func @transform_2(%arg0: i32, %arg1: i32) -> (i32, i32, i32) {
    %c0_i32 = arith.constant 0 : i32
    %c0_i32_0 = arith.constant 0 : i32
    return %arg0, %c0_i32, %arg1 : i32, i32, i32
  }
}

</mosaic_0001>

<bundles_post_ra>
// kernel: tpu_custom_call.1
= control target key start
LH: loop header
LB: loop body
LE: loop exit
PB: predicated region body
PF: predicated region fallthrough
CT: control target
= control target key end

     0   :  { %7 = vsyncpa [#allocation3], 0  ;;  %s840_s0 = inlined_call_operand.hbm [shape: f32[1,4], index: 0, kind: input, shape index: {}]   ;;  %s841_s1 = inlined_call_operand.hbm [shape: f32[2,4,256], index: 1, kind: input, shape index: {}]   ;;  %s842_s2 = inlined_call_operand.hbm [shape: f32[2,4,256], index: 2, kind: output, shape index: {}]  }
   0x1   :  { %8 = vsyncpa [#allocation6], 0 }
   0x2   :  { %10 = vsyncpa [#allocation6 + $0x1], 0 }
   0x3   :  { %11 = vsyncpa [#allocation4], 0 }
   0x4   :  { %13 = vsyncpa [#allocation4 + $0x1], 0  ;;  %s684_s9 = smov 0   ;;  %s686_s10 = smov 0  }
   0x5   :  { %s688_s11 = smov 0   ;;  %s690_s12 = smov 0  }
   0x6   :  { %s692_s13 = smov 0   ;;  %s694_s14 = smov 0  }
   0x7 LB: > { %s414_s15 = sadd.s32 4294967295, %s666_s14   ;;  %s415_s16 = sadd.s32 4294967294, %s666_s14   ;;  %s666_s14 = sphi %s694_s14, %s19_s14   ;;  %s662_s13 = sphi %s692_s13, %s854_s13   ;;  %s658_s12 = sphi %s690_s12, %s853_s12   ;;  %s654_s11 = sphi %s688_s11, %s852_s11   ;;  %s650_s10 = sphi %s686_s10, %s851_s10   ;;  %s646_s9 = sphi %s684_s9, %s850_s9  }
   0x8   : > { %p74_p0 = scmp.ne.s32.totalorder %s650_s10, %s646_s9  ;;  %p718_p1 = scmp.eq.s32.totalorder %s414_s15, 0 }
   0x9   : > { %p722_p2 = scmp.eq.s32.totalorder %s414_s15, 1  ;;  %p106_p3 = scmp.eq.s32.totalorder %s415_s16, 1 }
   0xa   : > { %p728_p4 = por %p718_p1, %p74_p0  ;;  %p416_p5 = scmp.ge.s32.totalorder %s666_s14, 1 }
   0xb   : > { %p733_p6 = por %p106_p3, %p74_p0  ;;  %p113_p7 = scmp.lt.s32.totalorder %s666_s14, 3 }
   0xc   : > { %s125_s23 = sshll.u32 %s840_s0, 4  ;;  %p418_p9 = scmp.ge.s32.totalorder %s666_s14, 2  ;;  %s126_s23 = int_to_ptr.hbm [resolvable:$true] %s125_s23 }
   0xd   : > { %p741_p8 = pnand %p416_p5, %p113_p7  ;;  %s668_s25 = smov [#allocation2]  }
   0xe   : > { %s127_s26 = sshll.u32 %s668_s25, 4  ;;  %s31_s27 = sadd.s32 1, %s662_s13  ;;  %s128_s26 = int_to_ptr.vmem [resolvable:$true] %s127_s26 }
   0xf   : > { %p447_p10 = pneg %p741_p8  ;;  %p33_p12 = scmp.ge.s32.totalorder %s31_s27, 2 }
  0x10   : > { %s61_s28 = sadd.s32 1, %s654_s11  ;;  %p68_p13 = scmp.ne.s32.totalorder %s654_s11, %s650_s10 }
  0x11   : > { %p448_p11 = pnand %p447_p10, %p718_p1  ;;  %p69_p0 = scmp.eq.s32.totalorder %s666_s14, 0 }
  0x12   : > { %s856_s27 = smov (%p33_p12, %s31_s27), 0  ;;  %p763_p5 = por %p722_p2, %p68_p13 }
  0x13   : > { %450 = dma.hbm_to_vmem [thread:$0]  (!%p448_p11), %s126_s23, 16, %s128_s26, [#allocation3]  }
  0x14   : > { %p757_p3 = por %p69_p0, %p68_p13  ;;  %s56_s3 = ssub.s32 %s662_s13, %s856_s27 }
  0x15   : > { %p460_p7 = scmp.lt.s32.totalorder %s666_s14, 2  ;;  %p59_p10 = scmp.eq.s32.totalorder %s56_s3, 0 }
  0x16   : > { %s138_s4 = sand.u32 1, %s654_s11   ;;  %s437_s7 = sshll.u32 %s662_s13, 3 }
  0x17   : > { %s419_s5 = sshll.u32 %s138_s4, 3  ;;  %s149_s16 = scalar_lea.hbm %s841_s1, %s437_s7 }
  0x18   : > { %s772_s6 = scalar_select %p59_p10, %s654_s11, %s61_s28  }
  0x19   : > { %s142_s21 = scalar_lea.vmem [#allocation5], %s419_s5  ;;  %s151_s18 = sshll.u32 %s149_s16, 4  ;;  %s152_s18 = int_to_ptr.hbm [resolvable:$true] %s151_s18 }
  0x1a   : > { %s153_s22 = sshll.u32 %s142_s21, 4  ;;  %p452_p2 = pnand %p460_p7, %p757_p3  ;;  %s154_s22 = int_to_ptr.vmem [resolvable:$true] %s153_s22 }
  0x1b   : > { %s139_s23 = scalar_lea.sflag [#allocation6], %s138_s4  ;;  %162 = sbr.rel (%p741_p8) target bundleno = 212 (0xd4), region = 28 }
  0x1c   : > { %454 = dma.hbm_to_vmem [thread:$0]  (!%p452_p2), %s152_s18, 128, %s154_s22, %s139_s23  }
  0x20   : > { %633 = dma.done.wait (%p718_p1), [#allocation3], 16  }
  0x21   : > { %635 = vsyncadd (%p718_p1), [#allocation3], 4294967280  ;;  %s787_s25 = sand.u32 1, %s650_s10  }
  0x22   : > { %s424_s26 = sshll.u32 %s787_s25, 3  ;;  %s170_s28 = scalar_lea.sflag [#allocation6], %s787_s25 }
  0x23   : > { %s173_s29 = scalar_lea.vmem [#allocation5], %s424_s26 }
  0x24   : > { %637 = dma.done.wait (%p728_p4), %s170_s28, 128  }
  0x25   : > { %639 = vsyncadd (%p728_p4), %s170_s28, 4294967168  ;;  %v198_v0 = vld [vmem:[%s173_s29] sm:$0xff]  ;;  %vm207_vm0 = vcmask 1043456   ;;  %v197_v1 = vld [vmem:[#allocation2] sm:$0x1]  ;;  %vm203_vm1 = vcmask 31744  }
  0x26   : > { %200 = vst [vmem:[#allocation1] ss:$2 sm:$0xff] %v198_v0  ;;  %s438_s17 = sshll.u32 %s658_s12, 3  ;;  %s194_s12 = scalar_lea.vmem [#allocation7], %s424_s26 }
  0x27   : > { %s313_s3 = scalar_lea.hbm %s842_s2, %s438_s17  ;;  %s315_s4 = sshll.u32 %s194_s12, 4  ;;  %s316_s4 = int_to_ptr.vmem [resolvable:$true] %s315_s4 }
  0x28   : > { %s317_s5 = sshll.u32 %s313_s3, 4  ;;  %s300_s7 = scalar_lea.sflag [#allocation4], %s787_s25  ;;  %s318_s5 = int_to_ptr.hbm [resolvable:$true] %s317_s5 }
  0x29   : > { %s594_s8 = sshra.s32 %s318_s5, 4  ;;  %s600_s22 = scalar_lea.hbm %s842_s2, 16  ;;  %s595_s8 = int_to_ptr.hbm [resolvable:$true] %s594_s8 }
  0x2a   : > { %s596_s15 = scalar_lea.hbm %s595_s8, 8  ;;  %p601_p11 = scmp.lt.s32.totalorder %s595_s8, %s842_s2 }
  0x2b   : > { %p597_p1 = scmp.ne.s32.totalorder %s595_s8, %s596_s15  ;;  %p602_p12 = scmp.lt.s32.totalorder %s600_s22, %s596_s15 }
  0x2d   : > { %v201_v2 = vld.sshfl [vmem:[#allocation1] sm:$0xff pattern:$0x75316420]  ;;  %v202_v3 = vld.sshfl [vmem:[#allocation1 + $0x8] sm:$0xff pattern:$0x75316420]  ;;  %p598_p4 = pnand %p597_p1, %p763_p5  ;;  %p603_p13 = por %p602_p12, %p601_p11 }
  0x2e   : > { %426 = vmatpush.msk.msra.mxu0 %vm207_vm0, %v201_v2  ;;  %428 = vmatpush.msk.msra.mxu1 %vm207_vm0, %v202_v3 }
  0x2f   : > { %427 = vmatmul.msk.f32.vlgmr.msra.gmra.mxu0 %vm203_vm1, %v197_v1  ;;  %429 = vmatmul.msk.f32.vlgmr.msra.gmra.mxu1 %vm203_vm1, %v197_v1  ;;  %p599_p8 = pneg %p598_p4 }
  0x31   : > { %p604_p0 = pnand %p603_p13, %p599_p8 }
  0xac   : > { %v229_v4 = vpop.f32.mrf.mxu0  ;;  %v249_v5 = vpop.f32.mrf.mxu1 }
  0xad   : > { %v430_v6 = vmul.f32 -1.442695, %v229_v4  ;;  %v431_v7 = vmul.f32 -1.442695, %v249_v5 }
  0xaf   : > { %512 = vpow2.f32 %v430_v6 }
  0xb0   : > { %514 = vpow2.f32 %v431_v7 }
  0xb5   : > { %v513_v8 = vpop.eup %512 }
  0xb6   : > { %v515_v9 = vpop.eup %514  ;;  %v258_v10 = vadd.f32 1.0, %v513_v8 }
  0xb7   : > { %v259_v11 = vadd.f32 1.0, %v515_v9 }
  0xb8   : > { %516 = vrcp.f32 %v258_v10  ;;  %v271_v19 = vand.u32 2147483648, %v258_v10  ;;  %v269_v21 = vand.u32 2147483647, %v258_v10  ;;  %vm265_vm4 = vweird.f32 %v258_v10 }
  0xb9   : > { %518 = vrcp.f32 %v259_v11  ;;  %v286_v20 = vand.u32 2147483648, %v259_v11  ;;  %v284_v23 = vand.u32 2147483647, %v259_v11  ;;  %vm280_vm6 = vweird.f32 %v259_v11 }
  0xba   : > { %v272_v27 = vor.u32 1.1754944e-38, %v271_v19  ;;  %vm270_vm8 = vcmp.eq.f32.partialorder %v269_v21, 8.507059e+37 }
  0xbb   : > { %v287_v28 = vor.u32 1.1754944e-38, %v286_v20  ;;  %vm285_vm9 = vcmp.eq.f32.partialorder %v284_v23, 8.507059e+37 }
  0xbe   : > { %v517_v12 = vpop.eup %516 }
  0xbf   : > { %v519_v13 = vpop.eup %518  ;;  %v261_v14 = vmul.f32 %v517_v12, %v258_v10  ;;  %vm266_vm2 = vweird.f32 %v517_v12 }
  0xc0   : > { %v276_v15 = vmul.f32 %v519_v13, %v259_v11  ;;  %vm281_vm3 = vweird.f32 %v519_v13  ;;  %vm267_vm5 = vmor %vm265_vm4, %vm266_vm2 }
  0xc1   : > { %v262_v16 = vsub.f32 1.0, %v261_v14  ;;  %vm282_vm7 = vmor %vm280_vm6, %vm281_vm3 }
  0xc2   : > { %v277_v17 = vsub.f32 1.0, %v276_v15 }
  0xc3   : > { %v263_v18 = vmul.f32 %v517_v12, %v262_v16 }
  0xc4   : > { %v278_v22 = vmul.f32 %v519_v13, %v277_v17 }
  0xc5   : > { %v264_v24 = vadd.f32 %v517_v12, %v263_v18 }
  0xc6   : > { %v279_v25 = vadd.f32 %v519_v13, %v278_v22 }
  0xc7   : > { %v268_v26 = vsel %vm267_vm5, %v517_v12, %v264_v24 }
  0xc8   : > { %v283_v29 = vsel %vm282_vm7, %v519_v13, %v279_v25  ;;  %v273_v30 = vsel %vm270_vm8, %v272_v27, %v268_v26 }
  0xc9   : > { %v288_v31 = vsel %vm285_vm9, %v287_v28, %v283_v29  ;;  %v290_v33 = vperm.slane %v273_v30, 0 }
  0xca   : > { %v291_v32 = vperm.slane %v288_v31, 0 }
  0xcc   : > { %v294_v34 = vrot.slane %v291_v32, 4 }
  0xce   : > { %v295_v35 = vsel %vm207_vm0, %v290_v33, %v294_v34 }
  0xcf   : > { %v297_v36 = vmul.f32 %v295_v35, %v198_v0 }
  0xd1   : > { %298 = vst [vmem:[%s194_s12] sm:$0xff] %v297_v36 }
  0xd2   : > { %607 = shalt.err (!%p604_p0)
}
  0xd3   : > { %445 = dma.vmem_to_hbm [thread:$0]  (%p763_p5), %s316_s4, 128, %s318_s5, %s300_s7  }
  0xd4 PF: > { %s329_s25 = sand.u32 1, %s646_s9   ;;  %p456_p3 = pnand %p418_p9, %p733_p6 }
  0xd5   : > { %s330_s26 = scalar_lea.sflag [#allocation4], %s329_s25 }
  0xd6   : > { %p457_p7 = pneg %p456_p3 }
  0xd8   : > { %641 = dma.done.wait (%p457_p7), %s330_s26, 128  }
  0xd9   : > { %643 = vsyncadd (%p457_p7), %s330_s26, 4294967168  ;;  %s19_s14 = sadd.s32 1, %s666_s14   ;;  %s850_s9 = smov %s650_s10 }
  0xda   : > { %p16_p10 = scmp.ge.s32.totalorder %s19_s14, 4   ;;  %s851_s10 = smov %s654_s11 }
  0xdb   : > { %s852_s11 = smov %s772_s6  ;;  %s853_s12 = smov %s662_s13 }
  0xdc   : > { %s854_s13 = smov %s856_s27  ;;  %18 = sbr.rel (!%p16_p10) target bundleno = 7 (0x7), region = 78 }
  0xe1   :  { %336 = vsyncpa [#allocation3], 1 }
  0xe2   :  { %338 = vsyncpa [#allocation3 + $0x1], 1 }
  0xe3   :  { %339 = vsyncpa [#allocation6], 1 }
  0xe4   :  { %341 = vsyncpa [#allocation6 + $0x1], 1 }
  0xe5   :  { %342 = vsyncpa [#allocation4], 1 }
  0xe6   :  { %344 = vsyncpa [#allocation4 + $0x1], 1 }

</bundles_post_ra>
